<compile_context>
chip_gen: v7x
topology: tpu7x:2x2x1
jax: 0.10.0
libtpu: 0.0.40
codegen_flags: <defaults>
</compile_context>

<pallas_src>
import functools

import jax
import jax.numpy as jnp
from jax.experimental import pallas as pl
from jax.experimental.pallas import tpu as pltpu


_LANE = 128
_TM_CAP = 512
_TN_CAP = 512
_TK_CAP_F32 = 1024
_TK_CAP_NARROW = 2048        # bf16 / fp8 operands
_SINGLE_BLOCK_K_MAX = 2048   # unaligned K up to this size -> one full-K block, no padding
_VMEM_LIMIT_BYTES = 48 * 1024 * 1024   # headroom under v7x's 64 MiB physical VMEM


def _round_up(v, m):
    return ((v + m - 1) // m) * m


def _largest_aligned_divisor(dim, base, cap):
    """Largest multiple of `base` that divides `dim` (dim % base == 0) and is <= cap."""
    best = base
    t = base
    while t <= dim and t <= cap:
        if dim % t == 0:
            best = t
        t += base
    return best


def _pick_tiles(m, kp, np_, op_itemsize):
    # Sublane granularity: 8 rows for 4-byte operands, 16 for bf16, 32 for fp8/int8.
    sub = 8 if op_itemsize >= 4 else (16 if op_itemsize == 2 else 32)
    tm = min(_TM_CAP, _round_up(m, sub))
    # Never over-cover tiny batches by more than the 8-row sublane minimum.
    tm = min(tm, _round_up(m, 8))
    tn = _largest_aligned_divisor(np_, _LANE, _TN_CAP)
    if kp % _LANE != 0:
        tk = kp                                  # small unaligned K: single full-K block
    else:
        tk_cap = _TK_CAP_F32 if op_itemsize >= 4 else _TK_CAP_NARROW
        tk = _largest_aligned_divisor(kp, _LANE, tk_cap)
    # v7x megacore: make sure at least one parallel axis has >= 2 blocks when possible.
    if pl.cdiv(m, tm) == 1 and (np_ // tn) == 1 and m >= 2 * sub:
        tm = _round_up(pl.cdiv(m, 2), sub)
    return tm, tn, tk


# ----------------------------- kernels ---------------------------------------


def _linear_single_k_kernel(x_ref, w_ref, b_ref, o_ref, *, precision):
    # Whole K in one block: no reduction loop, no scratch.
    o_ref[...] = (
        jnp.dot(x_ref[...], w_ref[...],
                preferred_element_type=jnp.float32, precision=precision)
        + b_ref[...]
    ).astype(o_ref.dtype)


def _linear_acc_out_kernel(x_ref, w_ref, b_ref, o_ref, *, precision):
    # float32 output: accumulate directly into the resident output block (no scratch).
    k = pl.program_id(2)

    @pl.when(k == 0)
    def _():
        o_ref[...] = jnp.zeros_like(o_ref)

    o_ref[...] += jnp.dot(x_ref[...], w_ref[...],
                          preferred_element_type=jnp.float32, precision=precision)

    @pl.when(k == pl.num_programs(2) - 1)
    def _():
        o_ref[...] += b_ref[...]


def _linear_scratch_kernel(x_ref, w_ref, b_ref, o_ref, acc_ref, *, precision):
    # Narrow output dtype: f32 VMEM accumulator, cast once on the final K step.
    k = pl.program_id(2)

    @pl.when(k == 0)
    def _():
        acc_ref[...] = jnp.zeros_like(acc_ref)

    acc_ref[...] += jnp.dot(x_ref[...], w_ref[...],
                            preferred_element_type=jnp.float32, precision=precision)

    @pl.when(k == pl.num_programs(2) - 1)
    def _():
        o_ref[...] = (acc_ref[...] + b_ref[...]).astype(o_ref.dtype)


# ----------------------------- wrappers --------------------------------------


def prepare_concat_fc_params(weight, bias, *, compute_dtype=jnp.bfloat16):
    """One-time parameter prep (hoist out of the per-step ODE path).

    weight: (dim_out, dim_in) — PyTorch nn.Linear layout.
    bias:   (dim_out,).
    compute_dtype: MXU operand dtype for the weight (bf16 default; None keeps dtype).
    Returns dict with a (K, N)-layout, lane-padded, pre-cast weight and f32 bias.
    """
    n, k = weight.shape
    assert bias.shape == (n,), "bias must be (dim_out,)"

    if k % _LANE == 0:
        kp = k
    elif k <= _SINGLE_BLOCK_K_MAX:
        kp = k                      # handled as a single full-K block, no padding at all
    else:
        kp = _round_up(k, _LANE)    # rare: large unaligned K (x padded per call)
    np_ = _round_up(n, _LANE)       # lane-dense output tiles

    w_kn = weight.T                                       # (K, N), one-time transpose
    if (kp, np_) != (k, n):
        w_kn = jnp.pad(w_kn, ((0, kp - k), (0, np_ - n)))
    if compute_dtype is not None:
        w_kn = w_kn.astype(compute_dtype)

    b = bias if np_ == n else jnp.pad(bias, (0, np_ - n))
    b = b.reshape(1, np_).astype(jnp.float32)

    return {"w_kn": w_kn, "b": b, "dim_in": k, "dim_out": n}


def concat_fc(t, x, params, *, precision=None):
    """Pallas implementation of ConcatFC.forward(t, x) == Linear(x).

    Args:
      t: unused scalar (mirrors the PyTorch signature).
      x: (batch, dim_in) array.
      params: output of prepare_concat_fc_params.
      precision: optional jax.lax.Precision for the MXU (HIGHEST for true f32).
    Returns:
      (batch, dim_out) array with x's dtype.
    """
    del t  # ConcatFC ignores t

    w = params["w_kn"]
    b = params["b"]
    k = params["dim_in"]
    n = params["dim_out"]

    m, kx = x.shape
    assert kx == k, "x must be (batch, dim_in)"
    kp, np_ = w.shape
    out_dtype = x.dtype

    if x.dtype != w.dtype:
        x = x.astype(w.dtype)                    # operand cast only (output keeps x dtype)
    if kp != k:
        x = jnp.pad(x, ((0, 0), (0, kp - k)))    # rare: large, non-128-aligned dim_in

    op_itemsize = jnp.dtype(w.dtype).itemsize
    tm, tn, tk = _pick_tiles(m, kp, np_, op_itemsize)
    grid = (pl.cdiv(m, tm), np_ // tn, kp // tk)
    grid_k = grid[2]

    if grid_k == 1:
        kernel = functools.partial(_linear_single_k_kernel, precision=precision)
        scratch = []
    elif out_dtype == jnp.float32:
        kernel = functools.partial(_linear_acc_out_kernel, precision=precision)
        scratch = []
    else:
        kernel = functools.partial(_linear_scratch_kernel, precision=precision)
        scratch = [pltpu.VMEM((tm, tn), jnp.float32)]

    out = pl.pallas_call(
        kernel,
        out_shape=jax.ShapeDtypeStruct((m, np_), out_dtype),
        grid_spec=pltpu.PrefetchScalarGridSpec(
            num_scalar_prefetch=0,
            grid=grid,
            in_specs=[
                pl.BlockSpec((tm, tk), lambda i, j, kk: (i, kk)),   # x  (M, K)
                pl.BlockSpec((tk, tn), lambda i, j, kk: (kk, j)),   # W  (K, N) — MXU-native
                pl.BlockSpec((1, tn), lambda i, j, kk: (0, j)),     # bias
            ],
            out_specs=pl.BlockSpec((tm, tn), lambda i, j, kk: (i, j)),
            scratch_shapes=scratch,
        ),
        compiler_params=pltpu.CompilerParams(
            # M/N parallel (megacore sharding on v7x), K is the reduction axis.
            dimension_semantics=("parallel", "parallel", "arbitrary"),
            vmem_limit_bytes=_VMEM_LIMIT_BYTES,
        ),
    )(x, w, b)

    return out[:, :n] if np_ != n else out


def concat_fc_from_linear(t, x, weight, bias, *, compute_dtype=jnp.bfloat16, precision=None):
    """Convenience one-shot wrapper (prefer preparing params once for repeated calls)."""
    params = prepare_concat_fc_params(weight, bias, compute_dtype=compute_dtype)
    return concat_fc(t, x, params, precision=precision)


# ----------------------------- self test -------------------------------------


if __name__ == "__main__":
    HIGHEST = jax.lax.Precision.HIGHEST
    key = jax.random.PRNGKey(0)

    # --- Small shapes consistent with the module: batch=8, dim_in=32, dim_out=32 ---
    batch, dim_in, dim_out = 8, 32, 32
    kx, kw, kb, krest = jax.random.split(key, 4)

    bound = 1.0 / jnp.sqrt(jnp.float32(dim_in))
    weight = jax.random.uniform(kw, (dim_out, dim_in), jnp.float32, -bound, bound)
    bias = jax.random.uniform(kb, (dim_out,), jnp.float32, -bound, bound)
    x = jax.random.normal(kx, (batch, dim_in), jnp.float32)
    t = jnp.float32(0.5)  # ignored, mirrors forward(t, x)

    # One-time parameter prep, hoisted out of the (repeated) forward path.
    params_bf16 = prepare_concat_fc_params(weight, bias)                       # bf16 MXU operands
    params_f32 = prepare_concat_fc_params(weight, bias, compute_dtype=jnp.float32)

    ref = jnp.dot(x, weight.T, precision=HIGHEST) + bias

    # 1) Default (bf16 operand) path, jitted step as it would run inside an ODE solver.
    step = jax.jit(lambda tt, xx: concat_fc(tt, xx, params_bf16))
    out = jax.block_until_ready(step(t, x))
    assert out.shape == (batch, dim_out)
    assert out.dtype == x.dtype
    assert jnp.allclose(out, ref, atol=2e-2, rtol=2e-2)
    out2nd = jax.block_until_ready(step(t, x + 1.0))   # repeated call, same prepared params
    assert out2nd.shape == (batch, dim_out)

    # 2) True-f32 path (f32 operands + HIGHEST MXU precision) — tight tolerance.
    out_f32 = jax.block_until_ready(concat_fc(t, x, params_f32, precision=HIGHEST))
    assert jnp.allclose(out_f32, ref, atol=1e-5, rtol=1e-5)

    # --- Larger shapes exercising the tiled grid, K reduction and partial M blocks ---
    m2, k2, n2 = 200, 4096, 384
    kx2, kw2, kb2 = jax.random.split(krest, 3)
    bound2 = 1.0 / jnp.sqrt(jnp.float32(k2))
    w2 = jax.random.uniform(kw2, (n2, k2), jnp.float32, -bound2, bound2)
    b2 = jax.random.uniform(kb2, (n2,), jnp.float32, -bound2, bound2)
    x2 = jax.random.normal(kx2, (m2, k2), jnp.float32)
    ref2 = jnp.dot(x2, w2.T, precision=HIGHEST) + b2

    p2_bf16 = prepare_concat_fc_params(w2, b2)
    p2_f32 = prepare_concat_fc_params(w2, b2, compute_dtype=jnp.float32)

    # 3) bf16 operands, f32 output, K-grid reduction (tk=2048 -> 2 K steps).
    out_a = jax.block_until_ready(concat_fc(t, x2, p2_bf16))
    assert out_a.shape == (m2, n2) and out_a.dtype == jnp.float32
    assert jnp.allclose(out_a, ref2, atol=3e-2, rtol=3e-2)

    # 4) f32 operands + HIGHEST, accumulate-into-output kernel (tk=1024 -> 4 K steps).
    out_b = jax.block_until_ready(concat_fc(t, x2, p2_f32, precision=HIGHEST))
    assert jnp.allclose(out_b, ref2, atol=1e-3, rtol=1e-3)

    # 5) bf16 activations (bf16 output) -> f32 scratch-accumulator kernel path.
    out_c = jax.block_until_ready(concat_fc(t, x2.astype(jnp.bfloat16), p2_bf16))
    assert out_c.dtype == jnp.bfloat16
    assert jnp.allclose(out_c.astype(jnp.float32), ref2, atol=3e-2, rtol=3e-2)

    print("KERNEL_OK")
</pallas_src>

<mosaic_0001>
module attributes {stable_mosaic.version = 11 : i64} {
  func.func @_linear_single_k_kernel(%arg0: i32, %arg1: i32, %arg2: i32, %arg3: memref<8x32xbf16, #tpu.memory_space<vmem>>, %arg4: memref<32x128xbf16, #tpu.memory_space<vmem>>, %arg5: memref<1x128xf32, #tpu.memory_space<vmem>>, %arg6: memref<8x128xf32, #tpu.memory_space<vmem>>) attributes {dimension_semantics = [#tpu.dimension_semantics<parallel>, #tpu.dimension_semantics<parallel>, #tpu.dimension_semantics<arbitrary>], iteration_bounds = array<i64: 1, 1, 1>, scalar_prefetch = 0 : i64, scratch_operands = 0 : i64, tpu.core_type = #tpu.core_type<tc>, window_params = [{transform_indices = @transform_0, window_bounds = array<i64: 8, 32>}, {transform_indices = @transform_1, window_bounds = array<i64: 32, 128>}, {transform_indices = @transform_2, window_bounds = array<i64: 1, 128>}, {transform_indices = @transform_3, window_bounds = array<i64: 8, 128>}]} {
    %c0 = arith.constant 0 : index
    %c0_0 = arith.constant 0 : index
    %0 = vector.load %arg3[%c0, %c0_0] : memref<8x32xbf16, #tpu.memory_space<vmem>>, vector<8x32xbf16>
    %c0_1 = arith.constant 0 : index
    %c0_2 = arith.constant 0 : index
    %1 = vector.load %arg4[%c0_1, %c0_2] : memref<32x128xbf16, #tpu.memory_space<vmem>>, vector<32x128xbf16>
    %cst = arith.constant dense<0.000000e+00> : vector<8x128xf32>
    %2 = tpu.matmul %0, %1, %cst {dimension_numbers = #tpu.dot_dimension_numbers<[1], [0], [0], [1], [0, 0, 1, 1], [], []>} : vector<8x32xbf16>, vector<32x128xbf16>, vector<8x128xf32> -> vector<8x128xf32>
    %c0_3 = arith.constant 0 : index
    %c0_4 = arith.constant 0 : index
    %3 = vector.load %arg5[%c0_3, %c0_4] : memref<1x128xf32, #tpu.memory_space<vmem>>, vector<1x128xf32>
    %4 = vector.broadcast %3 : vector<1x128xf32> to vector<8x128xf32>
    %5 = arith.addf %2, %4 : vector<8x128xf32>
    %c0_5 = arith.constant 0 : index
    %c0_6 = arith.constant 0 : index
    %6 = vector.load %arg6[%c0_5, %c0_6] : memref<8x128xf32, #tpu.memory_space<vmem>>, vector<8x128xf32>
    tpu.vector_store %arg6[%c0_5, %c0_6], %5 {strides = array<i32>} : memref<8x128xf32, #tpu.memory_space<vmem>>, vector<8x128xf32>,
    return
  }
  func.func @transform_0(%arg0: i32, %arg1: i32, %arg2: i32) -> (i32, i32) {
    %c0_i32 = arith.constant 0 : i32
    return %arg0, %arg2 : i32, i32
  }
  func.func @transform_1(%arg0: i32, %arg1: i32, %arg2: i32) -> (i32, i32) {
    %c0_i32 = arith.constant 0 : i32
    return %arg2, %arg1 : i32, i32
  }
  func.func @transform_2(%arg0: i32, %arg1: i32, %arg2: i32) -> (i32, i32) {
    %c0_i32 = arith.constant 0 : i32
    %c0_i32_0 = arith.constant 0 : i32
    return %c0_i32, %arg1 : i32, i32
  }
  func.func @transform_3(%arg0: i32, %arg1: i32, %arg2: i32) -> (i32, i32) {
    %c0_i32 = arith.constant 0 : i32
    return %arg0, %arg1 : i32, i32
  }
}

</mosaic_0001>

<bundles_post_ra>
// kernel: _lambda_.1
= control target key start
LH: loop header
LB: loop body
LE: loop exit
PB: predicated region body
PF: predicated region fallthrough
CT: control target
= control target key end

     0   :  { %v143_v1 = vmov 0.0   ;;  %vm144_vm0 = vmmov 0   ;;  %s190_s0 = inlined_call_operand.vmem [shape: bf16[8,32], index: 0, kind: input, shape index: {}]   ;;  %s191_s1 = inlined_call_operand.vmem [shape: bf16[32,128], index: 1, kind: input, shape index: {}]   ;;  %s192_s2 = inlined_call_operand.vmem [shape: f32[1,128], index: 2, kind: input, shape index: {}]   ;;  %s193_s3 = inlined_call_operand.hbm [shape: f32[8,128], index: 3, kind: output, shape index: {}]  }
   0x1   :  { %v117_v0 = vld [vmem:[%s191_s1] sm:$0xff]   ;;  %106 = vmatprep.subr.bf16.mxu0 %v143_v1  ;;  %v118_v2 = vld [vmem:[%s191_s1 + $0x8] sm:$0xff]   ;;  %110 = vmatprep.mubr.msk.bf16.mxu0 %vm144_vm0, %v143_v1 }
   0x2   :  { %107 = vmatpush3.bf16.msra.mxu0 %v117_v0 }
   0x3   :  { %108 = vmatprep.subr.bf16.mxu0 %v143_v1 }
   0x4   :  { %8 = vsyncpa [#allocation3], 0  ;;  %v16_v3 = vld [vmem:[%s190_s0] sm:$0xf]  ;;  %vm40_vm1 = vcmask 261120   ;;  %s145_s20 = smov [#allocation2]  }
   0x5   :  { %v99_v4 = vld [vmem:[%s192_s2] ss:$0 sm:$0xff]  ;;  %s91_s21 = sshll.u32 %s145_s20, 4  ;;  %s92_s21 = int_to_ptr.vmem [resolvable:$true] %s91_s21 }
   0x6   :  { %109 = vmatpush3.bf16.msra.mxu0 %v118_v2  ;;  %s119_s1 = scalar_lea.vmem %s92_s21, 128  ;;  %p124_p1 = scmp.lt.s32.totalorder %s92_s21, %s92_s21 }
   0x7   :  { %p120_p0 = scmp.ne.s32.totalorder %s92_s21, %s119_s1  ;;  %p125_p2 = scmp.lt.s32.totalorder %s119_s1, %s119_s1 }
   0x9   :  { %111 = vmatmul.mubr.msk.bf16.vlgmr.msra.gmra.mrb[0].mxu0 %vm40_vm1, %v16_v3  ;;  %p126_p3 = por %p125_p2, %p124_p1 }
   0xb   :  { %p127_p4 = pnand %p126_p3, %p120_p0 }
  0xdc   :  { %v78_v5 = vpop.f32.mrb[0].mxu0 }
  0xdd   :  { %v79_v6 = vadd.f32 %v99_v4, %v78_v5  ;;  %v112_v7 = vpop.f32.mrb[1].mxu0 }
  0xde   :  { %v81_v8 = vpop.f32.mrb[2].mxu0 }
  0xdf   :  { %84 = vst [vmem:[#allocation2] sm:$0xff] %v79_v6  ;;  %v113_v9 = vpop.f32.mrb[3].mxu0 }
  0xe0   :  { %130 = shalt.err (!%p127_p4)
}
  0xe1   :  { %s131_s2 = scalar_lea.hbm %s193_s3, 128 }
  0xe2   :  { %p132_p5 = scmp.ne.s32.totalorder %s193_s3, %s131_s2  ;;  %p135_p6 = scmp.lt.u32.totalorder %s131_s2, %s193_s3 }
  0xe4   :  { %p137_p7 = pnand %p135_p6, %p132_p5 }
  0xe6   :  { %140 = shalt.err (!%p137_p7)
}
  0xe7   :  { %94 = dma.vmem_to_hbm [thread:$0]  %s92_s21, 128, %s193_s3, [#allocation3]  }
  0xe8   :  { %141 = dma.done.wait [#allocation3], 128  }
  0xe9   :  { %142 = vsyncadd [#allocation3], 4294967168 }
  0xea   :  { %98 = vsyncpa [#allocation3], 1 }

</bundles_post_ra>
